<compile_context>
chip_gen: v5e
topology: v5e:2x2
jax: 0.10.0
libtpu: 0.0.40
codegen_flags: <defaults>
</compile_context>

<pallas_src>
import jax
import jax.numpy as jnp
from jax.experimental import pallas as pl
from jax.experimental.pallas import tpu as pltpu

_MAX_BLOCK_ROWS = 4096  # rows per block in the (rare) gridded path; mult. of 8


def _identity_kernel(w_ref, o_ref):
    # Forward of channel_masker: return the weights unchanged.
    o_ref[...] = w_ref[...]


def channel_masker_forward(weights: jax.Array) -> jax.Array:
    """Pallas-module equivalent of channel_masker.forward().

    The forward is a pure identity, so the optimal implementation launches no
    kernel at all (review item 1: removes 100% of the kernel cost).
    """
    return weights


def channel_masker_forward_pallas(weights: jax.Array) -> jax.Array:
    """Identity forward as an explicit Pallas kernel (fusion anchor only).

    Keeps the (num_features, 2) layout end-to-end (no relayout reshapes) and
    tiles the row dimension so VMEM usage stays bounded for any num_features.
    """
    nf, two = weights.shape

    # Block over rows only; last dim (=2) stays equal to the full array dim,
    # satisfying the (8,128)-or-full-dim rule.  Row block is either the whole
    # array (small nf) or a multiple of 8 (large nf).
    if nf <= _MAX_BLOCK_ROWS:
        block_rows = nf
    else:
        block_rows = _MAX_BLOCK_ROWS
    grid = (pl.cdiv(nf, block_rows),)

    out = pl.pallas_call(
        _identity_kernel,
        out_shape=jax.ShapeDtypeStruct((nf, two), weights.dtype),
        grid=grid,
        in_specs=[pl.BlockSpec((block_rows, two), lambda i: (i, 0))],
        out_specs=pl.BlockSpec((block_rows, two), lambda i: (i, 0)),
        compiler_params=pltpu.CompilerParams(
            dimension_semantics=("parallel",)
        ),
    )(weights)
    return out


if __name__ == "__main__":
    # Deterministic parameter init mirroring
    #   torch.distributions.Uniform(0, 1).sample((num_features, 2))
    num_features = 64
    key = jax.random.PRNGKey(0)
    weights = jax.random.uniform(
        key, (num_features, 2), dtype=jnp.float32, minval=0.0, maxval=1.0
    )

    # Default (optimal) path: no kernel, identity return.
    out_fast = jax.block_until_ready(channel_masker_forward(weights))

    # Pallas fusion-anchor path: run the kernel once and verify it.
    out_pallas = jax.block_until_ready(channel_masker_forward_pallas(weights))

    expected = jax.random.uniform(
        key, (num_features, 2), dtype=jnp.float32, minval=0.0, maxval=1.0
    )

    assert out_fast.shape == (num_features, 2)
    assert out_pallas.shape == (num_features, 2)
    assert out_pallas.dtype == jnp.float32
    assert bool(jnp.array_equal(out_fast, expected)), "forward() must return weights"
    assert bool(jnp.array_equal(out_pallas, expected)), "pallas forward must match"

    print("KERNEL_OK")
</pallas_src>

<mosaic_0001>
module attributes {stable_mosaic.version = 11 : i64} {
  func.func @_identity_kernel(%arg0: i32, %arg1: memref<64x2xf32, #tpu.memory_space<vmem>>, %arg2: memref<64x2xf32, #tpu.memory_space<vmem>>) attributes {dimension_semantics = [#tpu.dimension_semantics<parallel>], iteration_bounds = array<i64: 1>, scalar_prefetch = 0 : i64, scratch_operands = 0 : i64, tpu.core_type = #tpu.core_type<tc>, window_params = [{transform_indices = @transform_0, window_bounds = array<i64: 64, 2>}, {transform_indices = @transform_1, window_bounds = array<i64: 64, 2>}]} {
    %c0 = arith.constant 0 : index
    %c0_0 = arith.constant 0 : index
    %0 = vector.load %arg1[%c0, %c0_0] : memref<64x2xf32, #tpu.memory_space<vmem>>, vector<64x2xf32>
    %c0_1 = arith.constant 0 : index
    %c0_2 = arith.constant 0 : index
    %1 = vector.load %arg2[%c0_1, %c0_2] : memref<64x2xf32, #tpu.memory_space<vmem>>, vector<64x2xf32>
    tpu.vector_store %arg2[%c0_1, %c0_2], %0 {strides = array<i32>} : memref<64x2xf32, #tpu.memory_space<vmem>>, vector<64x2xf32>,
    return
  }
  func.func @transform_0(%arg0: i32) -> (i32, i32) {
    %c0_i32 = arith.constant 0 : i32
    %c0_i32_0 = arith.constant 0 : i32
    return %arg0, %c0_i32 : i32, i32
  }
  func.func @transform_1(%arg0: i32) -> (i32, i32) {
    %c0_i32 = arith.constant 0 : i32
    %c0_i32_0 = arith.constant 0 : i32
    return %arg0, %c0_i32 : i32, i32
  }
}

</mosaic_0001>

<bundles_post_ra>
// kernel: tpu_custom_call.1
= control target key start
LH: loop header
LB: loop body
LE: loop exit
PB: predicated region body
PF: predicated region fallthrough
CT: control target
= control target key end

     0   :  { %vm16_vm0 = vcmask 15360   ;;  %s95_s0 = inlined_call_operand.vmem [shape: f32[64,2], index: 0, kind: input, shape index: {}]   ;;  %s96_s1 = inlined_call_operand.vmem [shape: f32[64,2], index: 1, kind: output, shape index: {}]  }
   0x1   :  { %v8_v0 = vld [vmem:[%s95_s0] sm:$0xff]  ;;  %v9_v1 = vld [vmem:[%s95_s0 + $0x8] sm:$0xff]  ;;  %v10_v2 = vld [vmem:[%s95_s0 + $0x10] sm:$0xff] }
   0x2   :  { %17 = vst.msk [vmem:[%s96_s1] sm:$0xff] %vm16_vm0, %v8_v0  ;;  %v11_v3 = vld [vmem:[%s95_s0 + $0x18] sm:$0xff]  ;;  %v12_v4 = vld [vmem:[%s95_s0 + $0x20] sm:$0xff]  ;;  %v13_v5 = vld [vmem:[%s95_s0 + $0x28] sm:$0xff] }
   0x3   :  { %18 = vst.msk [vmem:[%s96_s1 + $0x8] sm:$0xff] %vm16_vm0, %v9_v1  ;;  %v14_v6 = vld [vmem:[%s95_s0 + $0x30] sm:$0xff]  ;;  %v15_v7 = vld [vmem:[%s95_s0 + $0x38] sm:$0xff] }
   0x4   :  { %19 = vst.msk [vmem:[%s96_s1 + $0x10] sm:$0xff] %vm16_vm0, %v10_v2 }
   0x5   :  { %20 = vst.msk [vmem:[%s96_s1 + $0x18] sm:$0xff] %vm16_vm0, %v11_v3 }
   0x6   :  { %21 = vst.msk [vmem:[%s96_s1 + $0x20] sm:$0xff] %vm16_vm0, %v12_v4 }
   0x7   :  { %22 = vst.msk [vmem:[%s96_s1 + $0x28] sm:$0xff] %vm16_vm0, %v13_v5 }
   0x8   :  { %23 = vst.msk [vmem:[%s96_s1 + $0x30] sm:$0xff] %vm16_vm0, %v14_v6 }
   0x9   :  { %24 = vst.msk [vmem:[%s96_s1 + $0x38] sm:$0xff] %vm16_vm0, %v15_v7 }

</bundles_post_ra>
